<compile_context>
chip_gen: v7x
topology: tpu7x:2x2x1
jax: 0.10.0
libtpu: 0.0.40
codegen_flags: <defaults>
</compile_context>

<pallas_src>
import functools

import jax
import jax.numpy as jnp
from jax.experimental import pallas as pl
from jax.experimental.pallas import tpu as pltpu


def _patch_proj_kernel(x_ref, w_ref, b_ref, o_ref):
    # x_ref: (tm, D), w_ref: (D, tn), b_ref: (1, tn), o_ref: (tm, tn)
    acc = jnp.dot(x_ref[...], w_ref[...], preferred_element_type=jnp.float32)
    o_ref[...] = (acc + b_ref[...]).astype(o_ref.dtype)


def _round_up(v, m):
    return ((v + m - 1) // m) * m


def _pick_tm(N, D, tm_max):
    # Keep the f32 activation block <= ~2 MiB so the double-buffered footprint of
    # all operands sits well under every chip's default scoped-VMEM limit.
    rows_budget = max(128, (2 * 1024 * 1024) // (4 * D))
    tm = min(tm_max, rows_budget)
    tm = (tm // 128) * 128           # MXU-friendly multiple of 128
    if N < tm:
        tm = _round_up(N, 8)         # small-problem fallback (sublane multiple)
    return max(tm, 8)


def _pick_tn(E, tn_max):
    if E > tn_max and E % tn_max == 0:
        return tn_max
    return E


def patch_embed_2d(x, weight, bias, patch_size, *, tm_max=512, tn_max=256):
    """Pallas implementation of PatchEmbed_2D.forward.

    x:      (B, C, T, H, W) float32     (PyTorch NCTHW video layout)
    weight: (embed_dim, C, p, p)        (PyTorch Conv2d weight layout)
    bias:   (embed_dim,)
    returns (B, T * (H//p) * (W//p), embed_dim)
    """
    B, C, T, H, W = x.shape
    p = patch_size
    E = weight.shape[0]
    assert H % p == 0 and W % p == 0, "input size must be divisible by patch size"
    nH, nW = H // p, W // p
    N = B * T * nH * nW
    D = C * p * p

    # ---- glue: patch extraction as ONE transpose pass (reshapes are free views) ----
    # (B, C, T, H, W) -> view (B, C, T, nH, p, nW, p) -> (B, T, nH, nW, C, p, p) -> (N, D)
    # Row order (b, t, hp, wp); column order (c, kh, kw) matches Conv2d weight flattening.
    xv = x.reshape(B, C, T, nH, p, nW, p)
    patches = jnp.transpose(xv, (0, 2, 3, 5, 1, 4, 6)).reshape(N, D)

    # Conv2d weight (E, C, p, p) -> (D, E); bias -> (1, E)
    w_mat = jnp.transpose(weight.reshape(E, D))
    b_mat = bias.reshape(1, E)

    # ---- tiling ----
    tm = _pick_tm(N, D, tm_max)
    tn = _pick_tn(E, tn_max)
    grid_m = pl.cdiv(N, tm)
    grid = (grid_m, E // tn)

    out = pl.pallas_call(
        _patch_proj_kernel,
        out_shape=jax.ShapeDtypeStruct((N, E), x.dtype),
        grid_spec=pltpu.PrefetchScalarGridSpec(
            num_scalar_prefetch=0,
            grid=grid,
            in_specs=[
                pl.BlockSpec((tm, D), lambda i, j: (i, 0)),
                pl.BlockSpec((D, tn), lambda i, j: (0, j)),
                pl.BlockSpec((1, tn), lambda i, j: (0, j)),
            ],
            out_specs=pl.BlockSpec((tm, tn), lambda i, j: (i, j)),
        ),
        compiler_params=pltpu.CompilerParams(
            dimension_semantics=("parallel", "parallel"),
            # Let XLA fuse the patch-rearrange producer into the activation input
            # DMA (avoids a standalone HBM round trip for the largest operand).
            allow_input_fusion=[True, False, False],
        ),
        cost_estimate=pl.CostEstimate(
            flops=2 * grid_m * tm * D * E,
            bytes_accessed=4 * (N * D + D * E + N * E),
            transcendentals=0,
        ),
    )(patches, w_mat, b_mat)

    # (N, E) -> (B, T*nH*nW, E)   ==  rearrange('(b t) c k -> b (t k) c')
    return out.reshape(B, T * nH * nW, E)


if __name__ == "__main__":
    # Small shapes consistent with the module: img_size=16, patch_size=4,
    # in_chans=4, embed_dim=32, num_frames=2, batch=2.
    B, C, T, H, W = 2, 4, 2, 16, 16
    p = 4
    E = 32

    key = jax.random.PRNGKey(0)
    kx, kw, kb = jax.random.split(key, 3)
    x = jax.random.normal(kx, (B, C, T, H, W), dtype=jnp.float32)
    # Deterministic synthetic Conv2d parameters (shapes from nn.Conv2d(C, E, p, p)).
    weight = jax.random.normal(kw, (E, C, p, p), dtype=jnp.float32) * 0.02
    bias = jax.random.normal(kb, (E,), dtype=jnp.float32) * 0.02

    fwd = jax.jit(functools.partial(patch_embed_2d, patch_size=p))
    y = fwd(x, weight, bias)
    y = jax.block_until_ready(y)

    # Reference check in plain JAX (conv == patch-matmul), not part of the kernel.
    xr = jnp.transpose(x, (0, 2, 1, 3, 4)).reshape(B * T, C, H, W)
    ref = jax.lax.conv_general_dilated(
        xr, weight, window_strides=(p, p), padding="VALID",
        dimension_numbers=("NCHW", "OIHW", "NCHW"))
    ref = ref + bias.reshape(1, E, 1, 1)
    ref = ref.reshape(B * T, E, -1)                        # (b t) c k
    ref = jnp.transpose(ref, (0, 2, 1)).reshape(B, -1, E)  # b (t k) c

    assert y.shape == (B, T * (H // p) * (W // p), E)
    assert jnp.allclose(y, ref, atol=1e-4, rtol=1e-4)

    print("KERNEL_OK")
</pallas_src>

<mosaic_0001>
module attributes {stable_mosaic.version = 11 : i64} {
  func.func @_patch_proj_kernel(%arg0: i32, %arg1: i32, %arg2: memref<64x64xf32, #tpu.memory_space<vmem>>, %arg3: memref<64x32xf32, #tpu.memory_space<vmem>>, %arg4: memref<1x32xf32, #tpu.memory_space<vmem>>, %arg5: memref<64x32xf32, #tpu.memory_space<vmem>>) attributes {dimension_semantics = [#tpu.dimension_semantics<parallel>, #tpu.dimension_semantics<parallel>], iteration_bounds = array<i64: 1, 1>, scalar_prefetch = 0 : i64, scratch_operands = 0 : i64, tpu.core_type = #tpu.core_type<tc>, window_params = [{transform_indices = @transform_0, window_bounds = array<i64: 64, 64>}, {transform_indices = @transform_1, window_bounds = array<i64: 64, 32>}, {transform_indices = @transform_2, window_bounds = array<i64: 1, 32>}, {transform_indices = @transform_3, window_bounds = array<i64: 64, 32>}]} {
    %c0 = arith.constant 0 : index
    %c0_0 = arith.constant 0 : index
    %0 = vector.load %arg2[%c0, %c0_0] : memref<64x64xf32, #tpu.memory_space<vmem>>, vector<64x64xf32>
    %c0_1 = arith.constant 0 : index
    %c0_2 = arith.constant 0 : index
    %1 = vector.load %arg3[%c0_1, %c0_2] : memref<64x32xf32, #tpu.memory_space<vmem>>, vector<64x32xf32>
    %cst = arith.constant dense<0.000000e+00> : vector<64x32xf32>
    %2 = tpu.matmul %0, %1, %cst {dimension_numbers = #tpu.dot_dimension_numbers<[1], [0], [0], [1], [0, 0, 1, 1], [], []>} : vector<64x64xf32>, vector<64x32xf32>, vector<64x32xf32> -> vector<64x32xf32>
    %c0_3 = arith.constant 0 : index
    %c0_4 = arith.constant 0 : index
    %3 = vector.load %arg4[%c0_3, %c0_4] : memref<1x32xf32, #tpu.memory_space<vmem>>, vector<1x32xf32>
    %4 = vector.broadcast %3 : vector<1x32xf32> to vector<64x32xf32>
    %5 = arith.addf %2, %4 : vector<64x32xf32>
    %c0_5 = arith.constant 0 : index
    %c0_6 = arith.constant 0 : index
    %6 = vector.load %arg5[%c0_5, %c0_6] : memref<64x32xf32, #tpu.memory_space<vmem>>, vector<64x32xf32>
    tpu.vector_store %arg5[%c0_5, %c0_6], %5 {strides = array<i32>} : memref<64x32xf32, #tpu.memory_space<vmem>>, vector<64x32xf32>,
    return
  }
  func.func @transform_0(%arg0: i32, %arg1: i32) -> (i32, i32) {
    %c0_i32 = arith.constant 0 : i32
    %c0_i32_0 = arith.constant 0 : i32
    return %arg0, %c0_i32 : i32, i32
  }
  func.func @transform_1(%arg0: i32, %arg1: i32) -> (i32, i32) {
    %c0_i32 = arith.constant 0 : i32
    %c0_i32_0 = arith.constant 0 : i32
    return %c0_i32, %arg1 : i32, i32
  }
  func.func @transform_2(%arg0: i32, %arg1: i32) -> (i32, i32) {
    %c0_i32 = arith.constant 0 : i32
    %c0_i32_0 = arith.constant 0 : i32
    return %c0_i32, %arg1 : i32, i32
  }
  func.func @transform_3(%arg0: i32, %arg1: i32) -> (i32, i32) {
    %c0_i32 = arith.constant 0 : i32
    return %arg0, %arg1 : i32, i32
  }
}

</mosaic_0001>

<bundles_post_ra>
// kernel: patch_embed_2d.1
= control target key start
LH: loop header
LB: loop body
LE: loop exit
PB: predicated region body
PF: predicated region fallthrough
CT: control target
= control target key end

     0   :  { %vm38_vm0 = vcmask 523264   ;;  %s399_s0 = inlined_call_operand.vmem [shape: f32[64,64], index: 0, kind: input, shape index: {}]   ;;  %s400_s1 = inlined_call_operand.vmem [shape: f32[64,32], index: 1, kind: input, shape index: {}]   ;;  %s401_s2 = inlined_call_operand.vmem [shape: f32[1,32], index: 2, kind: input, shape index: {}]   ;;  %s402_s3 = inlined_call_operand.hbm [shape: f32[64,32], index: 3, kind: output, shape index: {}]  }
   0x1   :  { %v23_v0 = vld [vmem:[%s400_s1] sm:$0xff]  ;;  %v24_v1 = vld [vmem:[%s400_s1 + $0x8] sm:$0xff]  ;;  %v25_v2 = vld [vmem:[%s400_s1 + $0x10] sm:$0xff] }
   0x2   :  { %v246_v3 = vpack.c.bf16 %v24_v1, %v23_v0  ;;  %v26_v4 = vld [vmem:[%s400_s1 + $0x18] sm:$0xff]  ;;  %v27_v6 = vld [vmem:[%s400_s1 + $0x20] sm:$0xff]  ;;  %v28_v7 = vld [vmem:[%s400_s1 + $0x28] sm:$0xff] }
   0x3   :  { %v250_v5 = vpack.c.bf16 %v26_v4, %v25_v2  ;;  %v15_v8 = vld [vmem:[%s399_s0] sm:$0xff]  ;;  %v254_v10 = vpack.c.bf16 %v28_v7, %v27_v6 }
   0x4   :  { %247 = vmatprep.subr.bf16.mxu0 %v246_v3  ;;  %262 = vmatprep.subr.bf16.mxu1 %v246_v3  ;;  %v19_v9 = vld [vmem:[%s399_s0 + $0x20] sm:$0xff] }
   0x5   :  { %249 = vmatpush3.bf16.msra.mxu0 %v246_v3  ;;  %266 = vmatpush3.bf16.msra.mxu1 %v246_v3 }
   0x6   :  { %251 = vmatprep.subr.bf16.mxu0 %v250_v5  ;;  %263 = vmatprep.subr.bf16.mxu1 %v250_v5 }
   0x7   :  { %8 = vsyncpa [#allocation3], 0  ;;  %v29_v11 = vld [vmem:[%s400_s1 + $0x30] sm:$0xff]  ;;  %v30_v12 = vld [vmem:[%s400_s1 + $0x38] sm:$0xff]  ;;  %234 = vmatprep.mubr.msk.f32.mxu0 %vm38_vm0, %v15_v8  ;;  %240 = vmatprep.mubr.msk.f32.mxu1 %vm38_vm0, %v19_v9  ;;  %vm168_vm1 = vcmask 261120   ;;  %s297_s18 = smov [#allocation2]  }
   0x8   :  { %v258_v13 = vpack.c.bf16 %v30_v12, %v29_v11  ;;  %v16_v14 = vld [vmem:[%s399_s0 + $0x8] sm:$0xff]  ;;  %v17_v16 = vld [vmem:[%s399_s0 + $0x10] sm:$0xff]  ;;  %v18_v18 = vld [vmem:[%s399_s0 + $0x18] sm:$0xff]  ;;  %s182_s19 = sshll.u32 %s297_s18, 4  ;;  %s183_s19 = int_to_ptr.vmem [resolvable:$true] %s182_s19 }
   0x9   :  { %253 = vmatpush3.bf16.msra.mxu0 %v250_v5  ;;  %267 = vmatpush3.bf16.msra.mxu1 %v250_v5  ;;  %v20_v15 = vld [vmem:[%s399_s0 + $0x28] sm:$0xff]  ;;  %v21_v17 = vld [vmem:[%s399_s0 + $0x30] sm:$0xff]  ;;  %v22_v19 = vld [vmem:[%s399_s0 + $0x38] sm:$0xff]  ;;  %s273_s0 = scalar_lea.vmem %s183_s19, 1024  ;;  %p278_p1 = scmp.lt.s32.totalorder %s183_s19, %s183_s19 }
   0xa   :  { %255 = vmatprep.subr.bf16.mxu0 %v254_v10  ;;  %264 = vmatprep.subr.bf16.mxu1 %v254_v10  ;;  %v193_v20 = vld [vmem:[%s401_s2] ss:$0 sm:$0xff]  ;;  %p274_p0 = scmp.ne.s32.totalorder %s183_s19, %s273_s0  ;;  %p279_p2 = scmp.lt.s32.totalorder %s273_s0, %s273_s0 }
   0xc   :  { %p280_p3 = por %p279_p2, %p278_p1 }
   0xd   :  { %257 = vmatpush3.bf16.msra.mxu0 %v254_v10  ;;  %268 = vmatpush3.bf16.msra.mxu1 %v254_v10 }
   0xe   :  { %259 = vmatprep.subr.bf16.mxu0 %v258_v13  ;;  %265 = vmatprep.subr.bf16.mxu1 %v258_v13  ;;  %p281_p4 = pnand %p280_p3, %p274_p0 }
  0x11   :  { %261 = vmatpush3.bf16.msra.mxu0 %v258_v13  ;;  %269 = vmatpush3.bf16.msra.mxu1 %v258_v13 }
  0x14   :  { %235 = vmatmul.mubr.msk.f32.vlgmr.msra.gmra.mrb[0].mxu0 %vm38_vm0, %v16_v14  ;;  %241 = vmatmul.mubr.msk.f32.vlgmr.msra.gmra.mrb[0].mxu1 %vm38_vm0, %v20_v15 }
  0x15   :  { %237 = vmatprep.mubr.msk.f32.mxu0 %vm38_vm0, %v17_v16  ;;  %243 = vmatprep.mubr.msk.f32.mxu1 %vm38_vm0, %v21_v17 }
  0x18   :  { %238 = vmatmul.mubr.msk.f32.gmra.mrb[2].mxu0 %vm38_vm0, %v18_v18  ;;  %244 = vmatmul.mubr.msk.f32.gmra.mrb[2].mxu1 %vm38_vm0, %v22_v19 }
  0xe7   :  { %v236_v21 = vpop.f32.mrb[0].mxu0  ;;  %v242_v22 = vpop.f32.mrb[0].mxu1 }
  0xe8   :  { %v135_v23 = vadd.f32 %v236_v21, %v193_v20  ;;  %v155_v24 = vadd.f32 %v242_v22, %v193_v20  ;;  %v129_v25 = vpop.f32.mrb[1].mxu0  ;;  %v149_v26 = vpop.f32.mrb[1].mxu1 }
  0xe9   :  { %v130_v27 = vadd.f32 %v193_v20, %v129_v25  ;;  %v150_v28 = vadd.f32 %v193_v20, %v149_v26 }
  0xea   :  { %170 = vst.msk [vmem:[#allocation2 + $0x8] sm:$0xff] %vm168_vm1, %v135_v23  ;;  %174 = vst.msk [vmem:[#allocation2 + $0x28] sm:$0xff] %vm168_vm1, %v155_v24 }
  0xeb   :  { %169 = vst.msk [vmem:[#allocation2] sm:$0xff] %vm168_vm1, %v130_v27  ;;  %173 = vst.msk [vmem:[#allocation2 + $0x20] sm:$0xff] %vm168_vm1, %v150_v28  ;;  %v239_v29 = vpop.f32.mrb[2].mxu0  ;;  %v245_v30 = vpop.f32.mrb[2].mxu1 }
  0xec   :  { %v145_v31 = vadd.f32 %v239_v29, %v193_v20  ;;  %v165_v32 = vadd.f32 %v245_v30, %v193_v20  ;;  %v139_v33 = vpop.f32.mrb[3].mxu0  ;;  %v159_v34 = vpop.f32.mrb[3].mxu1 }
  0xed   :  { %v140_v35 = vadd.f32 %v193_v20, %v139_v33  ;;  %v160_v36 = vadd.f32 %v193_v20, %v159_v34 }
  0xee   :  { %172 = vst.msk [vmem:[#allocation2 + $0x18] sm:$0xff] %vm168_vm1, %v145_v31  ;;  %176 = vst.msk [vmem:[#allocation2 + $0x38] sm:$0xff] %vm168_vm1, %v165_v32 }
  0xef   :  { %171 = vst.msk [vmem:[#allocation2 + $0x10] sm:$0xff] %vm168_vm1, %v140_v35  ;;  %175 = vst.msk [vmem:[#allocation2 + $0x30] sm:$0xff] %vm168_vm1, %v160_v36 }
  0xf0   :  { %284 = shalt.err (!%p281_p4)
}
  0xf1   :  { %s285_s21 = scalar_lea.hbm %s402_s3, 1024 }
  0xf2   :  { %p286_p5 = scmp.ne.s32.totalorder %s402_s3, %s285_s21  ;;  %p289_p6 = scmp.lt.u32.totalorder %s285_s21, %s402_s3 }
  0xf4   :  { %p291_p7 = pnand %p289_p6, %p286_p5 }
  0xf6   :  { %294 = shalt.err (!%p291_p7)
}
  0xf7   :  { %s298_s26 = smov 128   ;;  %s299_s27 = smov 8  }
  0xf8   :  { %188 = dma.vmem_to_hbm [thread:$0]  %s183_s19, 1024, %s402_s3, [#allocation3], %s298_s26, %s298_s26, %s299_s27  }
  0xf9   :  { %295 = dma.done.wait [#allocation3], 1024  }
  0xfa   :  { %296 = vsyncadd [#allocation3], 4294966272 }
  0xfb   :  { %192 = vsyncpa [#allocation3], 1 }

</bundles_post_ra>
